<compile_context>
chip_gen: v6e
topology: v6e:2x2x1
jax: 0.10.0
libtpu: 0.0.40
codegen_flags: <defaults>
</compile_context>

<pallas_src>
import jax
import jax.numpy as jnp
from jax.experimental import pallas as pl
from jax.experimental.pallas import tpu as pltpu


def render_image_kernel(vox_ref, out_ref):
    # vox_ref: (1, 3) f32 -- self.voxels.  out_ref: (2, 3) f32 slab.
    v = vox_ref[...]                                               # (1, 3)

    # channel = [0, 0, test_voxel[2] * 5]
    lane = jax.lax.broadcasted_iota(jnp.int32, v.shape, 1)         # (1, 3)
    ch = jnp.where(lane == 2, v * 5.0, jnp.zeros_like(v))          # (1, 3)

    out_ref[0:1, :] = ch   # row 0: shared r / g / b channel
    out_ref[1:2, :] = v    # row 1: intersecting voxel (copy of the parameter)


def custom_model_forward(voxels, x):
    """JAX/Pallas equivalent of CustomModel.forward(x).

    voxels: (1, 3) float32 parameter (nn.Parameter `self.voxels`).
    x: unused by the module's forward pass (kept for API parity).
    Returns (r, g, b, intersecting), each (1, 3) float32.
    """
    del x  # forward() never touches x in the PyTorch module
    out = pl.pallas_call(
        render_image_kernel,
        in_specs=[pl.BlockSpec(memory_space=pltpu.MemorySpace.VMEM)],
        out_specs=pl.BlockSpec(memory_space=pltpu.MemorySpace.VMEM),
        out_shape=jax.ShapeDtypeStruct((2, voxels.shape[1]), voxels.dtype),
    )(voxels)
    ch = out[0:1, :]       # (1, 3)
    inter = out[1:2, :]    # (1, 3)
    return ch, ch, ch, inter


if __name__ == "__main__":
    key = jax.random.PRNGKey(0)
    k_vox, k_x = jax.random.split(key)

    # Deterministic parameter init: self.voxels is a (1, 3) "intersecting voxel".
    voxels = jax.random.uniform(k_vox, (1, 3), dtype=jnp.float32)

    # Example input (NCHW), unused by the forward pass, matching the module.
    x = jax.random.normal(k_x, (2, 4, 16, 16), dtype=jnp.float32)

    r, g, b, inter = jax.jit(custom_model_forward)(voxels, x)
    jax.block_until_ready((r, g, b, inter))

    # Reference check in plain JAX.
    test_voxel = voxels[0]
    ref_ch = jnp.array([[0.0, 0.0, test_voxel[2] * 5.0]], dtype=jnp.float32)
    ref_inter = test_voxel[None, :]
    assert r.shape == (1, 3) and inter.shape == (1, 3)
    assert jnp.allclose(r, ref_ch, atol=1e-6)
    assert jnp.allclose(g, ref_ch, atol=1e-6)
    assert jnp.allclose(b, ref_ch, atol=1e-6)
    assert jnp.allclose(inter, ref_inter, atol=1e-6)

    print("KERNEL_OK")
</pallas_src>

<mosaic_0001>
module attributes {stable_mosaic.version = 11 : i64} {
  func.func @render_image_kernel(%arg0: memref<1x3xf32, #tpu.memory_space<vmem>>, %arg1: memref<2x3xf32, #tpu.memory_space<vmem>>) attributes {dimension_semantics = [], scalar_prefetch = 0 : i64, scratch_operands = 0 : i64, tpu.core_type = #tpu.core_type<tc>} {
    %c0 = arith.constant 0 : index
    %c0_0 = arith.constant 0 : index
    %0 = vector.load %arg0[%c0, %c0_0] : memref<1x3xf32, #tpu.memory_space<vmem>>, vector<1x3xf32>
    %1 = tpu.iota {dimensions = array<i32: 1>} : vector<1x3xi32>
    %c2_i32 = arith.constant 2 : i32
    %2 = vector.broadcast %c2_i32 : i32 to vector<1x3xi32>
    %3 = arith.cmpi eq, %1, %2 : vector<1x3xi32>
    %cst = arith.constant 5.000000e+00 : f32
    %4 = vector.broadcast %cst : f32 to vector<1x3xf32>
    %5 = arith.mulf %0, %4 : vector<1x3xf32>
    %cst_1 = arith.constant 0.000000e+00 : f32
    %6 = vector.broadcast %cst_1 : f32 to vector<1x3xf32>
    %7 = arith.select %3, %5, %6 : vector<1x3xi1>, vector<1x3xf32>
    %c0_2 = arith.constant 0 : index
    %c0_3 = arith.constant 0 : index
    %8 = vector.load %arg1[%c0_2, %c0_3] : memref<2x3xf32, #tpu.memory_space<vmem>>, vector<1x3xf32>
    tpu.vector_store %arg1[%c0_2, %c0_3], %7 {strides = array<i32>} : memref<2x3xf32, #tpu.memory_space<vmem>>, vector<1x3xf32>,
    %c1 = arith.constant 1 : index
    %c0_4 = arith.constant 0 : index
    %9 = vector.load %arg1[%c1, %c0_4] : memref<2x3xf32, #tpu.memory_space<vmem>>, vector<1x3xf32>
    tpu.vector_store %arg1[%c1, %c0_4], %0 {strides = array<i32>} : memref<2x3xf32, #tpu.memory_space<vmem>>, vector<1x3xf32>,
    return
  }
}

</mosaic_0001>

<bundles_post_ra>
// kernel: custom_model_forward.1
= control target key start
LH: loop header
LB: loop body
LE: loop exit
PB: predicated region body
PF: predicated region fallthrough
CT: control target
= control target key end

     0   :  { %6 = vsyncpa [#allocation3], 0  ;;  %s57_s6 = smov [#allocation2]   ;;  %s77_s0 = inlined_call_operand.hbm [shape: f32[1,3], index: 0, kind: input, shape index: {}]   ;;  %s78_s1 = inlined_call_operand.vmem [shape: f32[2,3], index: 1, kind: output, shape index: {}]  }
   0x1   :  { %s13_s7 = sshll.u32 %s57_s6, 4  ;;  %s14_s7 = int_to_ptr.vmem [resolvable:$true] %s13_s7 }
   0x2   :  { %s43_s8 = scalar_lea.vmem %s14_s7, 16  ;;  %s47_s9 = scalar_lea.vmem %s14_s7, 32 }
   0x3   :  { %p44_p0 = scmp.ne.s32.totalorder %s14_s7, %s43_s8  ;;  %p48_p1 = scmp.lt.s32.totalorder %s14_s7, %s14_s7 }
   0x4   :  { %p49_p2 = scmp.lt.s32.totalorder %s47_s9, %s43_s8 }
   0x6   :  { %p50_p3 = por %p49_p2, %p48_p1 }
   0x8   :  { %p51_p4 = pnand %p50_p3, %p44_p0 }
   0xa   :  { %54 = shalt.err (!%p51_p4)
}
   0xb   :  { %16 = dma.hbm_to_vmem [thread:$0]  %s77_s0, 16, %s14_s7, [#allocation3]  }
   0xc   :  { %55 = dma.done.wait [#allocation3], 16  }
   0xd   :  { %56 = vsyncadd [#allocation3], 4294967280  ;;  %v21_v0 = vlaneseq  ;;  %vm26_vm0 = vcmask 16384   ;;  %v20_v2 = vld [vmem:[#allocation2] sm:$0x1] }
   0xe   :  { %v24_v3 = vmul.f32 5.0, %v20_v2  ;;  %28 = vst.msk [vmem:[%s78_s1 + $0x1] sm:$0x1] %vm26_vm0, %v20_v2 }
   0xf   :  { %v22_v1 = vand.u32 127, %v21_v0 }
  0x11   :  { %vm23_vm1 = vcmp.eq.s32.totalorder %v22_v1, 2 }
  0x12   :  { %v25_v4 = vsel %vm23_vm1, %v24_v3, 0.0 }
  0x13   :  { %27 = vst.msk [vmem:[%s78_s1] sm:$0x1] %vm26_vm0, %v25_v4 }
  0x14   :  { %33 = vsyncpa [#allocation3], 1 }

</bundles_post_ra>
